<compile_context>
chip_gen: v5e
topology: v5e:2x2
jax: 0.10.0
libtpu: 0.0.40
codegen_flags: <defaults>
</compile_context>

<pallas_src>
import functools

import jax
import jax.numpy as jnp
import numpy as np
from jax import lax
from jax.experimental import pallas as pl
from jax.experimental.pallas import tpu as pltpu


def conv_lstm_kernel(emb_ref, wconv_ref, bconv_ref, wih_ref, whh_ref, bg_ref,
                     wfc_ref, bfc_ref, out_ref, xproj_ref):
    T, B, E = emb_ref.shape          # time-major batch block: (T, tb, E)
    H4 = whh_ref.shape[1]            # 4 * hidden
    H = H4 // 4

    # ---- Conv1d(k=3, pad=1) + ReLU as ONE (T*B, 3E) x (3E, E) matmul ----
    x = emb_ref[...]                                     # (T, B, E) bf16
    zrow = jnp.zeros((1, B, E), x.dtype)
    x_m1 = jnp.concatenate([zrow, x[:T - 1]], axis=0)    # x[t-1]
    x_p1 = jnp.concatenate([x[1:], zrow], axis=0)        # x[t+1]
    xcat = jnp.concatenate([x_m1, x, x_p1], axis=-1)     # (T, B, 3E)
    conv = jnp.dot(xcat.reshape(T * B, 3 * E), wconv_ref[...],
                   preferred_element_type=jnp.float32)
    conv = jnp.maximum(conv + bconv_ref[...], 0.0)       # (T*B, E) f32

    # ---- Hoisted input projection for all gates (bias folded in once) ----
    xproj = jnp.dot(conv.astype(wih_ref.dtype), wih_ref[...],
                    preferred_element_type=jnp.float32) + bg_ref[...]
    xproj_ref[...] = xproj.reshape(T, B, H4)             # time-major (T,B,4H)

    # ---- LSTM recurrence, PyTorch gate order (i, f, g, o) ----
    whh = whh_ref[...]                                   # (H, 4H) bf16

    def step(t, carry):
        h, c = carry                                     # f32 state
        gates = xproj_ref[t] + jnp.dot(h.astype(whh.dtype), whh,
                                       preferred_element_type=jnp.float32)
        i = jax.nn.sigmoid(gates[:, 0 * H:1 * H])
        f = jax.nn.sigmoid(gates[:, 1 * H:2 * H])
        g = jnp.tanh(gates[:, 2 * H:3 * H])
        o = jax.nn.sigmoid(gates[:, 3 * H:4 * H])
        c_new = f * c + i * g
        h_new = o * jnp.tanh(c_new)
        return (h_new, c_new)

    h0 = jnp.zeros((B, H), jnp.float32)
    c0 = jnp.zeros((B, H), jnp.float32)
    h_final, _ = lax.fori_loop(0, T, step, (h0, c0), unroll=True)

    # ---- Final linear layer ----
    out = jnp.dot(h_final.astype(wfc_ref.dtype), wfc_ref[...],
                  preferred_element_type=jnp.float32) + bfc_ref[...]
    out_ref[...] = out.astype(out_ref.dtype)


@functools.partial(jax.jit, static_argnames=("block_b",))
def conv_lstm_classifier(text, params, *, block_b=None):
    """text: (B, T) int32 token ids.  Returns (B, O) float32 logits."""
    B, T = text.shape
    emb_table = params["embedding"]            # (V, E) f32
    E = emb_table.shape[1]
    H4 = params["w_hh_all"].shape[1]
    O = params["fc_b"].shape[-1]

    if T == 0:  # matches the torch early-exit (static shape in JAX)
        return jnp.zeros((B, O), jnp.float32)

    # Embedding gather is glue (data-dependent gather stays in plain JAX).
    # Gather TIME-MAJOR and cast to bf16 so the kernel reads a lane-dense slab
    # and never transposes, and HBM traffic for the activation slab is halved.
    # TODO(synk): fuse the gather into the kernel (PrefetchScalarGridSpec +
    # data-dependent index_map) to avoid materializing (T, B, E) in HBM.
    emb_tm = jnp.take(emb_table, text.T, axis=0).astype(jnp.bfloat16)  # (T,B,E)

    # Batch grid: shards rows across TensorCores on multi-TC chips (v7x) and
    # bounds per-step VMEM at production sizes (block sizes here are tiny, so
    # the default scoped VMEM limit is more than enough).
    if block_b is None:
        block_b = min(B, 8)
    if B % block_b != 0:
        block_b = B
    grid = (B // block_b,)

    def replicated(arr):
        zeros = (0,) * arr.ndim
        return pl.BlockSpec(arr.shape, lambda b: zeros)

    weights = (params["conv_w3"], params["conv_b"], params["w_ih_all"],
               params["w_hh_all"], params["b_all"], params["fc_wT"],
               params["fc_b"])

    return pl.pallas_call(
        conv_lstm_kernel,
        out_shape=jax.ShapeDtypeStruct((B, O), jnp.float32),
        grid=grid,
        in_specs=[pl.BlockSpec((T, block_b, E), lambda b: (0, b, 0))]
                 + [replicated(w) for w in weights],
        out_specs=pl.BlockSpec((block_b, O), lambda b: (b, 0)),
        scratch_shapes=[pltpu.VMEM((T, block_b, H4), jnp.float32)],
        compiler_params=pltpu.CompilerParams(
            dimension_semantics=("parallel",)),
    )(emb_tm, *weights)


def make_params(key, vocab_size, embedding_dim, hidden_dim, output_dim,
                padding_idx):
    E, H, O = embedding_dim, hidden_dim, output_dim
    ks = jax.random.split(key, 9)
    scale = 0.1

    emb = scale * jax.random.normal(ks[0], (vocab_size, E), jnp.float32)
    emb = emb.at[padding_idx].set(0.0)   # padding_idx row is zero

    conv_w = scale * jax.random.normal(ks[1], (E, E, 3), jnp.float32)  # (out,in,k)
    conv_b = scale * jax.random.normal(ks[2], (E,), jnp.float32)

    w_ih = scale * jax.random.normal(ks[3], (4 * H, E), jnp.float32)
    w_hh = scale * jax.random.normal(ks[4], (4 * H, H), jnp.float32)
    b_ih = scale * jax.random.normal(ks[5], (4 * H,), jnp.float32)
    b_hh = scale * jax.random.normal(ks[6], (4 * H,), jnp.float32)

    fc_w = scale * jax.random.normal(ks[7], (O, H), jnp.float32)
    fc_b = scale * jax.random.normal(ks[8], (O,), jnp.float32)

    mm_dtype = jnp.bfloat16  # MXU-operand dtype (v6e/v7x native bf16)
    conv_w3 = jnp.transpose(conv_w, (2, 1, 0)).reshape(3 * E, E)
    params = {
        "embedding": emb,
        # taps merged along K: rows [W_{t-1}; W_t; W_{t+1}] with
        # W_k[c_in, c_out] = conv_w[c_out, c_in, k]
        "conv_w3": conv_w3.astype(mm_dtype),            # (3E, E)
        "conv_b": conv_b.reshape(1, E),                 # f32
        # fused gate weights (PyTorch order i,f,g,o along the 4H axis)
        "w_ih_all": w_ih.T.astype(mm_dtype),            # (E, 4H)
        "w_hh_all": w_hh.T.astype(mm_dtype),            # (H, 4H)
        "b_all": (b_ih + b_hh).reshape(1, 4 * H),       # f32, folded once
        "fc_wT": fc_w.T.astype(mm_dtype),               # (H, O)
        "fc_b": fc_b.reshape(1, O),                     # f32
    }
    raw = {"emb": emb, "conv_w": conv_w, "conv_b": conv_b, "w_ih": w_ih,
           "w_hh": w_hh, "b_ih": b_ih, "b_hh": b_hh, "fc_w": fc_w,
           "fc_b": fc_b}
    return params, raw


def reference_forward(text, raw):
    """Pure-JAX f32 reference mirroring the PyTorch module."""
    embedded = jnp.take(raw["emb"], text, axis=0)            # (B, T, E)
    B, T, E = embedded.shape
    # Conv1d NCL with padding=1
    x_ncl = jnp.transpose(embedded, (0, 2, 1))               # (B, E, T)
    conv = lax.conv_general_dilated(
        x_ncl, raw["conv_w"], window_strides=(1,), padding=((1, 1),),
        dimension_numbers=("NCH", "OIH", "NCH"))
    conv = jax.nn.relu(conv + raw["conv_b"][None, :, None])
    conv = jnp.transpose(conv, (0, 2, 1))                    # (B, T, E)
    H = raw["w_hh"].shape[1]
    h = jnp.zeros((B, H), jnp.float32)
    c = jnp.zeros((B, H), jnp.float32)
    for t in range(T):
        gates = conv[:, t, :] @ raw["w_ih"].T + h @ raw["w_hh"].T \
                + raw["b_ih"] + raw["b_hh"]
        i, f, g, o = jnp.split(gates, 4, axis=-1)
        c = jax.nn.sigmoid(f) * c + jax.nn.sigmoid(i) * jnp.tanh(g)
        h = jax.nn.sigmoid(o) * jnp.tanh(c)
    return h @ raw["fc_w"].T + raw["fc_b"]


if __name__ == "__main__":
    vocab_size, embedding_dim, hidden_dim, output_dim = 50, 32, 32, 4
    padding_idx = 0
    B, T = 2, 8

    key = jax.random.PRNGKey(0)
    kp, kt = jax.random.split(key)
    params, raw = make_params(kp, vocab_size, embedding_dim, hidden_dim,
                              output_dim, padding_idx)
    text = jax.random.randint(kt, (B, T), 0, vocab_size, dtype=jnp.int32)

    out = conv_lstm_classifier(text, params)
    out = jax.block_until_ready(out)

    ref = reference_forward(text, raw)
    # bf16 MXU operands (f32 accumulate / f32 gate math) -> slightly looser
    # tolerance than the pure-f32 version.
    np.testing.assert_allclose(np.asarray(out), np.asarray(ref),
                               rtol=2e-2, atol=2e-2)
    print("KERNEL_OK")
</pallas_src>

<mosaic_0001>
module attributes {stable_mosaic.version = 11 : i64} {
  func.func @conv_lstm_kernel(%arg0: i32, %arg1: memref<8x2x32xbf16, #tpu.memory_space<vmem>>, %arg2: memref<96x32xbf16, #tpu.memory_space<vmem>>, %arg3: memref<1x32xf32, #tpu.memory_space<vmem>>, %arg4: memref<32x128xbf16, #tpu.memory_space<vmem>>, %arg5: memref<32x128xbf16, #tpu.memory_space<vmem>>, %arg6: memref<1x128xf32, #tpu.memory_space<vmem>>, %arg7: memref<32x4xbf16, #tpu.memory_space<vmem>>, %arg8: memref<1x4xf32, #tpu.memory_space<vmem>>, %arg9: memref<2x4xf32, #tpu.memory_space<vmem>>, %arg10: memref<8x2x128xf32, #tpu.memory_space<vmem>>) attributes {dimension_semantics = [#tpu.dimension_semantics<parallel>], iteration_bounds = array<i64: 1>, scalar_prefetch = 0 : i64, scratch_operands = 1 : i64, tpu.core_type = #tpu.core_type<tc>, window_params = [{transform_indices = @transform_0, window_bounds = array<i64: 8, 2, 32>}, {pipeline_mode = #tpu.pipeline_mode<synchronous>, transform_indices = @transform_1, window_bounds = array<i64: 96, 32>}, {pipeline_mode = #tpu.pipeline_mode<synchronous>, transform_indices = @transform_2, window_bounds = array<i64: 1, 32>}, {pipeline_mode = #tpu.pipeline_mode<synchronous>, transform_indices = @transform_3, window_bounds = array<i64: 32, 128>}, {pipeline_mode = #tpu.pipeline_mode<synchronous>, transform_indices = @transform_4, window_bounds = array<i64: 32, 128>}, {pipeline_mode = #tpu.pipeline_mode<synchronous>, transform_indices = @transform_5, window_bounds = array<i64: 1, 128>}, {pipeline_mode = #tpu.pipeline_mode<synchronous>, transform_indices = @transform_6, window_bounds = array<i64: 32, 4>}, {pipeline_mode = #tpu.pipeline_mode<synchronous>, transform_indices = @transform_7, window_bounds = array<i64: 1, 4>}, {transform_indices = @transform_8, window_bounds = array<i64: 2, 4>}]} {
    %c0 = arith.constant 0 : index
    %c0_0 = arith.constant 0 : index
    %c0_1 = arith.constant 0 : index
    %0 = vector.load %arg1[%c0, %c0_0, %c0_1] : memref<8x2x32xbf16, #tpu.memory_space<vmem>>, vector<8x2x32xbf16>
    %cst = arith.constant 0.000000e+00 : bf16
    %1 = vector.broadcast %cst : bf16 to vector<1x2x32xbf16>
    %2 = vector.extract_strided_slice %0 {offsets = [0, 0, 0], sizes = [7, 2, 32], strides = [1, 1, 1]} : vector<8x2x32xbf16> to vector<7x2x32xbf16>
    %3 = tpu.concatenate %1, %2 in 0 : vector<1x2x32xbf16>, vector<7x2x32xbf16> -> vector<8x2x32xbf16>
    %4 = vector.extract_strided_slice %0 {offsets = [1, 0, 0], sizes = [7, 2, 32], strides = [1, 1, 1]} : vector<8x2x32xbf16> to vector<7x2x32xbf16>
    %5 = tpu.concatenate %4, %1 in 0 : vector<7x2x32xbf16>, vector<1x2x32xbf16> -> vector<8x2x32xbf16>
    %6 = tpu.concatenate %3, %0, %5 in 2 : vector<8x2x32xbf16>, vector<8x2x32xbf16>, vector<8x2x32xbf16> -> vector<8x2x96xbf16>
    %7 = vector.shape_cast %6 : vector<8x2x96xbf16> to vector<16x96xbf16>
    %c0_2 = arith.constant 0 : index
    %c0_3 = arith.constant 0 : index
    %8 = vector.load %arg2[%c0_2, %c0_3] : memref<96x32xbf16, #tpu.memory_space<vmem>>, vector<96x32xbf16>
    %cst_4 = arith.constant dense<0.000000e+00> : vector<16x32xf32>
    %9 = tpu.matmul %7, %8, %cst_4 {dimension_numbers = #tpu.dot_dimension_numbers<[1], [0], [0], [1], [0, 0, 1, 1], [], []>} : vector<16x96xbf16>, vector<96x32xbf16>, vector<16x32xf32> -> vector<16x32xf32>
    %c0_5 = arith.constant 0 : index
    %c0_6 = arith.constant 0 : index
    %10 = vector.load %arg3[%c0_5, %c0_6] : memref<1x32xf32, #tpu.memory_space<vmem>>, vector<1x32xf32>
    %11 = vector.broadcast %10 : vector<1x32xf32> to vector<16x32xf32>
    %12 = arith.addf %9, %11 : vector<16x32xf32>
    %cst_7 = arith.constant 0.000000e+00 : f32
    %13 = vector.broadcast %cst_7 : f32 to vector<16x32xf32>
    %14 = arith.maximumf %12, %13 : vector<16x32xf32>
    %15 = arith.truncf %14 : vector<16x32xf32> to vector<16x32xbf16>
    %c0_8 = arith.constant 0 : index
    %c0_9 = arith.constant 0 : index
    %16 = vector.load %arg4[%c0_8, %c0_9] : memref<32x128xbf16, #tpu.memory_space<vmem>>, vector<32x128xbf16>
    %cst_10 = arith.constant dense<0.000000e+00> : vector<16x128xf32>
    %17 = tpu.matmul %15, %16, %cst_10 {dimension_numbers = #tpu.dot_dimension_numbers<[1], [0], [0], [1], [0, 0, 1, 1], [], []>} : vector<16x32xbf16>, vector<32x128xbf16>, vector<16x128xf32> -> vector<16x128xf32>
    %c0_11 = arith.constant 0 : index
    %c0_12 = arith.constant 0 : index
    %18 = vector.load %arg6[%c0_11, %c0_12] : memref<1x128xf32, #tpu.memory_space<vmem>>, vector<1x128xf32>
    %19 = vector.broadcast %18 : vector<1x128xf32> to vector<16x128xf32>
    %20 = arith.addf %17, %19 : vector<16x128xf32>
    %21 = vector.shape_cast %20 : vector<16x128xf32> to vector<8x2x128xf32>
    %c0_13 = arith.constant 0 : index
    %c0_14 = arith.constant 0 : index
    %c0_15 = arith.constant 0 : index
    %22 = vector.load %arg10[%c0_13, %c0_14, %c0_15] : memref<8x2x128xf32, #tpu.memory_space<vmem>>, vector<8x2x128xf32>
    tpu.vector_store %arg10[%c0_13, %c0_14, %c0_15], %21 {strides = array<i32>} : memref<8x2x128xf32, #tpu.memory_space<vmem>>, vector<8x2x128xf32>,
    %c0_16 = arith.constant 0 : index
    %c0_17 = arith.constant 0 : index
    %23 = vector.load %arg5[%c0_16, %c0_17] : memref<32x128xbf16, #tpu.memory_space<vmem>>, vector<32x128xbf16>
    %cst_18 = arith.constant 0.000000e+00 : f32
    %24 = vector.broadcast %cst_18 : f32 to vector<2x32xf32>
    %cst_19 = arith.constant 0.000000e+00 : f32
    %25 = vector.broadcast %cst_19 : f32 to vector<2x32xf32>
    %c0_i32 = arith.constant 0 : i32
    %26 = arith.index_cast %c0_i32 : i32 to index
    %c0_20 = arith.constant 0 : index
    %c0_21 = arith.constant 0 : index
    %27 = vector.load %arg10[%26, %c0_20, %c0_21] : memref<8x2x128xf32, #tpu.memory_space<vmem>>, vector<1x2x128xf32>
    %28 = vector.shape_cast %27 : vector<1x2x128xf32> to vector<2x128xf32>
    %29 = arith.truncf %24 : vector<2x32xf32> to vector<2x32xbf16>
    %cst_22 = arith.constant dense<0.000000e+00> : vector<2x128xf32>
    %30 = tpu.matmul %29, %23, %cst_22 {dimension_numbers = #tpu.dot_dimension_numbers<[1], [0], [0], [1], [0, 0, 1, 1], [], []>} : vector<2x32xbf16>, vector<32x128xbf16>, vector<2x128xf32> -> vector<2x128xf32>
    %31 = arith.addf %28, %30 : vector<2x128xf32>
    %32 = vector.extract_strided_slice %31 {offsets = [0, 0], sizes = [2, 32], strides = [1, 1]} : vector<2x128xf32> to vector<2x32xf32>
    %33 = arith.negf %32 : vector<2x32xf32>
    %34 = math.exp %33 : vector<2x32xf32>
    %cst_23 = arith.constant 1.000000e+00 : f32
    %35 = vector.broadcast %cst_23 : f32 to vector<2x32xf32>
    %36 = arith.addf %35, %34 : vector<2x32xf32>
    %37 = arith.divf %35, %36 : vector<2x32xf32>
    %38 = vector.extract_strided_slice %31 {offsets = [0, 32], sizes = [2, 32], strides = [1, 1]} : vector<2x128xf32> to vector<2x32xf32>
    %39 = arith.negf %38 : vector<2x32xf32>
    %40 = math.exp %39 : vector<2x32xf32>
    %cst_24 = arith.constant 1.000000e+00 : f32
    %41 = vector.broadcast %cst_24 : f32 to vector<2x32xf32>
    %42 = arith.addf %41, %40 : vector<2x32xf32>
    %43 = arith.divf %41, %42 : vector<2x32xf32>
    %44 = vector.extract_strided_slice %31 {offsets = [0, 64], sizes = [2, 32], strides = [1, 1]} : vector<2x128xf32> to vector<2x32xf32>
    %45 = math.tanh %44 : vector<2x32xf32>
    %46 = vector.extract_strided_slice %31 {offsets = [0, 96], sizes = [2, 32], strides = [1, 1]} : vector<2x128xf32> to vector<2x32xf32>
    %47 = arith.negf %46 : vector<2x32xf32>
    %48 = math.exp %47 : vector<2x32xf32>
    %cst_25 = arith.constant 1.000000e+00 : f32
    %49 = vector.broadcast %cst_25 : f32 to vector<2x32xf32>
    %50 = arith.addf %49, %48 : vector<2x32xf32>
    %51 = arith.divf %49, %50 : vector<2x32xf32>
    %52 = arith.mulf %43, %25 : vector<2x32xf32>
    %53 = arith.mulf %37, %45 : vector<2x32xf32>
    %54 = arith.addf %52, %53 : vector<2x32xf32>
    %55 = math.tanh %54 : vector<2x32xf32>
    %56 = arith.mulf %51, %55 : vector<2x32xf32>
    %c1_i32 = arith.constant 1 : i32
    %57 = arith.index_cast %c1_i32 : i32 to index
    %c0_26 = arith.constant 0 : index
    %c0_27 = arith.constant 0 : index
    %58 = vector.load %arg10[%57, %c0_26, %c0_27] : memref<8x2x128xf32, #tpu.memory_space<vmem>>, vector<1x2x128xf32>
    %59 = vector.shape_cast %58 : vector<1x2x128xf32> to vector<2x128xf32>
    %60 = arith.truncf %56 : vector<2x32xf32> to vector<2x32xbf16>
    %cst_28 = arith.constant dense<0.000000e+00> : vector<2x128xf32>
    %61 = tpu.matmul %60, %23, %cst_28 {dimension_numbers = #tpu.dot_dimension_numbers<[1], [0], [0], [1], [0, 0, 1, 1], [], []>} : vector<2x32xbf16>, vector<32x128xbf16>, vector<2x128xf32> -> vector<2x128xf32>
    %62 = arith.addf %59, %61 : vector<2x128xf32>
    %63 = vector.extract_strided_slice %62 {offsets = [0, 0], sizes = [2, 32], strides = [1, 1]} : vector<2x128xf32> to vector<2x32xf32>
    %64 = arith.negf %63 : vector<2x32xf32>
    %65 = math.exp %64 : vector<2x32xf32>
    %cst_29 = arith.constant 1.000000e+00 : f32
    %66 = vector.broadcast %cst_29 : f32 to vector<2x32xf32>
    %67 = arith.addf %66, %65 : vector<2x32xf32>
    %68 = arith.divf %66, %67 : vector<2x32xf32>
    %69 = vector.extract_strided_slice %62 {offsets = [0, 32], sizes = [2, 32], strides = [1, 1]} : vector<2x128xf32> to vector<2x32xf32>
    %70 = arith.negf %69 : vector<2x32xf32>
    %71 = math.exp %70 : vector<2x32xf32>
    %cst_30 = arith.constant 1.000000e+00 : f32
    %72 = vector.broadcast %cst_30 : f32 to vector<2x32xf32>
    %73 = arith.addf %72, %71 : vector<2x32xf32>
    %74 = arith.divf %72, %73 : vector<2x32xf32>
    %75 = vector.extract_strided_slice %62 {offsets = [0, 64], sizes = [2, 32], strides = [1, 1]} : vector<2x128xf32> to vector<2x32xf32>
    %76 = math.tanh %75 : vector<2x32xf32>
    %77 = vector.extract_strided_slice %62 {offsets = [0, 96], sizes = [2, 32], strides = [1, 1]} : vector<2x128xf32> to vector<2x32xf32>
    %78 = arith.negf %77 : vector<2x32xf32>
    %79 = math.exp %78 : vector<2x32xf32>
    %cst_31 = arith.constant 1.000000e+00 : f32
    %80 = vector.broadcast %cst_31 : f32 to vector<2x32xf32>
    %81 = arith.addf %80, %79 : vector<2x32xf32>
    %82 = arith.divf %80, %81 : vector<2x32xf32>
    %83 = arith.mulf %74, %54 : vector<2x32xf32>
    %84 = arith.mulf %68, %76 : vector<2x32xf32>
    %85 = arith.addf %83, %84 : vector<2x32xf32>
    %86 = math.tanh %85 : vector<2x32xf32>
    %87 = arith.mulf %82, %86 : vector<2x32xf32>
    %c2_i32 = arith.constant 2 : i32
    %88 = arith.index_cast %c2_i32 : i32 to index
    %c0_32 = arith.constant 0 : index
    %c0_33 = arith.constant 0 : index
    %89 = vector.load %arg10[%88, %c0_32, %c0_33] : memref<8x2x128xf32, #tpu.memory_space<vmem>>, vector<1x2x128xf32>
    %90 = vector.shape_cast %89 : vector<1x2x128xf32> to vector<2x128xf32>
    %91 = arith.truncf %87 : vector<2x32xf32> to vector<2x32xbf16>
    %cst_34 = arith.constant dense<0.000000e+00> : vector<2x128xf32>
    %92 = tpu.matmul %91, %23, %cst_34 {dimension_numbers = #tpu.dot_dimension_numbers<[1], [0], [0], [1], [0, 0, 1, 1], [], []>} : vector<2x32xbf16>, vector<32x128xbf16>, vector<2x128xf32> -> vector<2x128xf32>
    %93 = arith.addf %90, %92 : vector<2x128xf32>
    %94 = vector.extract_strided_slice %93 {offsets = [0, 0], sizes = [2, 32], strides = [1, 1]} : vector<2x128xf32> to vector<2x32xf32>
    %95 = arith.negf %94 : vector<2x32xf32>
    %96 = math.exp %95 : vector<2x32xf32>
    %cst_35 = arith.constant 1.000000e+00 : f32
    %97 = vector.broadcast %cst_35 : f32 to vector<2x32xf32>
    %98 = arith.addf %97, %96 : vector<2x32xf32>
    %99 = arith.divf %97, %98 : vector<2x32xf32>
    %100 = vector.extract_strided_slice %93 {offsets = [0, 32], sizes = [2, 32], strides = [1, 1]} : vector<2x128xf32> to vector<2x32xf32>
    %101 = arith.negf %100 : vector<2x32xf32>
    %102 = math.exp %101 : vector<2x32xf32>
    %cst_36 = arith.constant 1.000000e+00 : f32
    %103 = vector.broadcast %cst_36 : f32 to vector<2x32xf32>
    %104 = arith.addf %103, %102 : vector<2x32xf32>
    %105 = arith.divf %103, %104 : vector<2x32xf32>
    %106 = vector.extract_strided_slice %93 {offsets = [0, 64], sizes = [2, 32], strides = [1, 1]} : vector<2x128xf32> to vector<2x32xf32>
    %107 = math.tanh %106 : vector<2x32xf32>
    %108 = vector.extract_strided_slice %93 {offsets = [0, 96], sizes = [2, 32], strides = [1, 1]} : vector<2x128xf32> to vector<2x32xf32>
    %109 = arith.negf %108 : vector<2x32xf32>
    %110 = math.exp %109 : vector<2x32xf32>
    %cst_37 = arith.constant 1.000000e+00 : f32
    %111 = vector.broadcast %cst_37 : f32 to vector<2x32xf32>
    %112 = arith.addf %111, %110 : vector<2x32xf32>
    %113 = arith.divf %111, %112 : vector<2x32xf32>
    %114 = arith.mulf %105, %85 : vector<2x32xf32>
    %115 = arith.mulf %99, %107 : vector<2x32xf32>
    %116 = arith.addf %114, %115 : vector<2x32xf32>
    %117 = math.tanh %116 : vector<2x32xf32>
    %118 = arith.mulf %113, %117 : vector<2x32xf32>
    %c3_i32 = arith.constant 3 : i32
    %119 = arith.index_cast %c3_i32 : i32 to index
    %c0_38 = arith.constant 0 : index
    %c0_39 = arith.constant 0 : index
    %120 = vector.load %arg10[%119, %c0_38, %c0_39] : memref<8x2x128xf32, #tpu.memory_space<vmem>>, vector<1x2x128xf32>
    %121 = vector.shape_cast %120 : vector<1x2x128xf32> to vector<2x128xf32>
    %122 = arith.truncf %118 : vector<2x32xf32> to vector<2x32xbf16>
    %cst_40 = arith.constant dense<0.000000e+00> : vector<2x128xf32>
    %123 = tpu.matmul %122, %23, %cst_40 {dimension_numbers = #tpu.dot_dimension_numbers<[1], [0], [0], [1], [0, 0, 1, 1], [], []>} : vector<2x32xbf16>, vector<32x128xbf16>, vector<2x128xf32> -> vector<2x128xf32>
    %124 = arith.addf %121, %123 : vector<2x128xf32>
    %125 = vector.extract_strided_slice %124 {offsets = [0, 0], sizes = [2, 32], strides = [1, 1]} : vector<2x128xf32> to vector<2x32xf32>
    %126 = arith.negf %125 : vector<2x32xf32>
    %127 = math.exp %126 : vector<2x32xf32>
    %cst_41 = arith.constant 1.000000e+00 : f32
    %128 = vector.broadcast %cst_41 : f32 to vector<2x32xf32>
    %129 = arith.addf %128, %127 : vector<2x32xf32>
    %130 = arith.divf %128, %129 : vector<2x32xf32>
    %131 = vector.extract_strided_slice %124 {offsets = [0, 32], sizes = [2, 32], strides = [1, 1]} : vector<2x128xf32> to vector<2x32xf32>
    %132 = arith.negf %131 : vector<2x32xf32>
    %133 = math.exp %132 : vector<2x32xf32>
    %cst_42 = arith.constant 1.000000e+00 : f32
    %134 = vector.broadcast %cst_42 : f32 to vector<2x32xf32>
    %135 = arith.addf %134, %133 : vector<2x32xf32>
    %136 = arith.divf %134, %135 : vector<2x32xf32>
    %137 = vector.extract_strided_slice %124 {offsets = [0, 64], sizes = [2, 32], strides = [1, 1]} : vector<2x128xf32> to vector<2x32xf32>
    %138 = math.tanh %137 : vector<2x32xf32>
    %139 = vector.extract_strided_slice %124 {offsets = [0, 96], sizes = [2, 32], strides = [1, 1]} : vector<2x128xf32> to vector<2x32xf32>
    %140 = arith.negf %139 : vector<2x32xf32>
    %141 = math.exp %140 : vector<2x32xf32>
    %cst_43 = arith.constant 1.000000e+00 : f32
    %142 = vector.broadcast %cst_43 : f32 to vector<2x32xf32>
    %143 = arith.addf %142, %141 : vector<2x32xf32>
    %144 = arith.divf %142, %143 : vector<2x32xf32>
    %145 = arith.mulf %136, %116 : vector<2x32xf32>
    %146 = arith.mulf %130, %138 : vector<2x32xf32>
    %147 = arith.addf %145, %146 : vector<2x32xf32>
    %148 = math.tanh %147 : vector<2x32xf32>
    %149 = arith.mulf %144, %148 : vector<2x32xf32>
    %c4_i32 = arith.constant 4 : i32
    %150 = arith.index_cast %c4_i32 : i32 to index
    %c0_44 = arith.constant 0 : index
    %c0_45 = arith.constant 0 : index
    %151 = vector.load %arg10[%150, %c0_44, %c0_45] : memref<8x2x128xf32, #tpu.memory_space<vmem>>, vector<1x2x128xf32>
    %152 = vector.shape_cast %151 : vector<1x2x128xf32> to vector<2x128xf32>
    %153 = arith.truncf %149 : vector<2x32xf32> to vector<2x32xbf16>
    %cst_46 = arith.constant dense<0.000000e+00> : vector<2x128xf32>
    %154 = tpu.matmul %153, %23, %cst_46 {dimension_numbers = #tpu.dot_dimension_numbers<[1], [0], [0], [1], [0, 0, 1, 1], [], []>} : vector<2x32xbf16>, vector<32x128xbf16>, vector<2x128xf32> -> vector<2x128xf32>
    %155 = arith.addf %152, %154 : vector<2x128xf32>
    %156 = vector.extract_strided_slice %155 {offsets = [0, 0], sizes = [2, 32], strides = [1, 1]} : vector<2x128xf32> to vector<2x32xf32>
    %157 = arith.negf %156 : vector<2x32xf32>
    %158 = math.exp %157 : vector<2x32xf32>
    %cst_47 = arith.constant 1.000000e+00 : f32
    %159 = vector.broadcast %cst_47 : f32 to vector<2x32xf32>
    %160 = arith.addf %159, %158 : vector<2x32xf32>
    %161 = arith.divf %159, %160 : vector<2x32xf32>
    %162 = vector.extract_strided_slice %155 {offsets = [0, 32], sizes = [2, 32], strides = [1, 1]} : vector<2x128xf32> to vector<2x32xf32>
    %163 = arith.negf %162 : vector<2x32xf32>
    %164 = math.exp %163 : vector<2x32xf32>
    %cst_48 = arith.constant 1.000000e+00 : f32
    %165 = vector.broadcast %cst_48 : f32 to vector<2x32xf32>
    %166 = arith.addf %165, %164 : vector<2x32xf32>
    %167 = arith.divf %165, %166 : vector<2x32xf32>
    %168 = vector.extract_strided_slice %155 {offsets = [0, 64], sizes = [2, 32], strides = [1, 1]} : vector<2x128xf32> to vector<2x32xf32>
    %169 = math.tanh %168 : vector<2x32xf32>
    %170 = vector.extract_strided_slice %155 {offsets = [0, 96], sizes = [2, 32], strides = [1, 1]} : vector<2x128xf32> to vector<2x32xf32>
    %171 = arith.negf %170 : vector<2x32xf32>
    %172 = math.exp %171 : vector<2x32xf32>
    %cst_49 = arith.constant 1.000000e+00 : f32
    %173 = vector.broadcast %cst_49 : f32 to vector<2x32xf32>
    %174 = arith.addf %173, %172 : vector<2x32xf32>
    %175 = arith.divf %173, %174 : vector<2x32xf32>
    %176 = arith.mulf %167, %147 : vector<2x32xf32>
    %177 = arith.mulf %161, %169 : vector<2x32xf32>
    %178 = arith.addf %176, %177 : vector<2x32xf32>
    %179 = math.tanh %178 : vector<2x32xf32>
    %180 = arith.mulf %175, %179 : vector<2x32xf32>
    %c5_i32 = arith.constant 5 : i32
    %181 = arith.index_cast %c5_i32 : i32 to index
    %c0_50 = arith.constant 0 : index
    %c0_51 = arith.constant 0 : index
    %182 = vector.load %arg10[%181, %c0_50, %c0_51] : memref<8x2x128xf32, #tpu.memory_space<vmem>>, vector<1x2x128xf32>
    %183 = vector.shape_cast %182 : vector<1x2x128xf32> to vector<2x128xf32>
    %184 = arith.truncf %180 : vector<2x32xf32> to vector<2x32xbf16>
    %cst_52 = arith.constant dense<0.000000e+00> : vector<2x128xf32>
    %185 = tpu.matmul %184, %23, %cst_52 {dimension_numbers = #tpu.dot_dimension_numbers<[1], [0], [0], [1], [0, 0, 1, 1], [], []>} : vector<2x32xbf16>, vector<32x128xbf16>, vector<2x128xf32> -> vector<2x128xf32>
    %186 = arith.addf %183, %185 : vector<2x128xf32>
    %187 = vector.extract_strided_slice %186 {offsets = [0, 0], sizes = [2, 32], strides = [1, 1]} : vector<2x128xf32> to vector<2x32xf32>
    %188 = arith.negf %187 : vector<2x32xf32>
    %189 = math.exp %188 : vector<2x32xf32>
    %cst_53 = arith.constant 1.000000e+00 : f32
    %190 = vector.broadcast %cst_53 : f32 to vector<2x32xf32>
    %191 = arith.addf %190, %189 : vector<2x32xf32>
    %192 = arith.divf %190, %191 : vector<2x32xf32>
    %193 = vector.extract_strided_slice %186 {offsets = [0, 32], sizes = [2, 32], strides = [1, 1]} : vector<2x128xf32> to vector<2x32xf32>
    %194 = arith.negf %193 : vector<2x32xf32>
    %195 = math.exp %194 : vector<2x32xf32>
    %cst_54 = arith.constant 1.000000e+00 : f32
    %196 = vector.broadcast %cst_54 : f32 to vector<2x32xf32>
    %197 = arith.addf %196, %195 : vector<2x32xf32>
    %198 = arith.divf %196, %197 : vector<2x32xf32>
    %199 = vector.extract_strided_slice %186 {offsets = [0, 64], sizes = [2, 32], strides = [1, 1]} : vector<2x128xf32> to vector<2x32xf32>
    %200 = math.tanh %199 : vector<2x32xf32>
    %201 = vector.extract_strided_slice %186 {offsets = [0, 96], sizes = [2, 32], strides = [1, 1]} : vector<2x128xf32> to vector<2x32xf32>
    %202 = arith.negf %201 : vector<2x32xf32>
    %203 = math.exp %202 : vector<2x32xf32>
    %cst_55 = arith.constant 1.000000e+00 : f32
    %204 = vector.broadcast %cst_55 : f32 to vector<2x32xf32>
    %205 = arith.addf %204, %203 : vector<2x32xf32>
    %206 = arith.divf %204, %205 : vector<2x32xf32>
    %207 = arith.mulf %198, %178 : vector<2x32xf32>
    %208 = arith.mulf %192, %200 : vector<2x32xf32>
    %209 = arith.addf %207, %208 : vector<2x32xf32>
    %210 = math.tanh %209 : vector<2x32xf32>
    %211 = arith.mulf %206, %210 : vector<2x32xf32>
    %c6_i32 = arith.constant 6 : i32
    %212 = arith.index_cast %c6_i32 : i32 to index
    %c0_56 = arith.constant 0 : index
    %c0_57 = arith.constant 0 : index
    %213 = vector.load %arg10[%212, %c0_56, %c0_57] : memref<8x2x128xf32, #tpu.memory_space<vmem>>, vector<1x2x128xf32>
    %214 = vector.shape_cast %213 : vector<1x2x128xf32> to vector<2x128xf32>
    %215 = arith.truncf %211 : vector<2x32xf32> to vector<2x32xbf16>
    %cst_58 = arith.constant dense<0.000000e+00> : vector<2x128xf32>
    %216 = tpu.matmul %215, %23, %cst_58 {dimension_numbers = #tpu.dot_dimension_numbers<[1], [0], [0], [1], [0, 0, 1, 1], [], []>} : vector<2x32xbf16>, vector<32x128xbf16>, vector<2x128xf32> -> vector<2x128xf32>
    %217 = arith.addf %214, %216 : vector<2x128xf32>
    %218 = vector.extract_strided_slice %217 {offsets = [0, 0], sizes = [2, 32], strides = [1, 1]} : vector<2x128xf32> to vector<2x32xf32>
    %219 = arith.negf %218 : vector<2x32xf32>
    %220 = math.exp %219 : vector<2x32xf32>
    %cst_59 = arith.constant 1.000000e+00 : f32
    %221 = vector.broadcast %cst_59 : f32 to vector<2x32xf32>
    %222 = arith.addf %221, %220 : vector<2x32xf32>
    %223 = arith.divf %221, %222 : vector<2x32xf32>
    %224 = vector.extract_strided_slice %217 {offsets = [0, 32], sizes = [2, 32], strides = [1, 1]} : vector<2x128xf32> to vector<2x32xf32>
    %225 = arith.negf %224 : vector<2x32xf32>
    %226 = math.exp %225 : vector<2x32xf32>
    %cst_60 = arith.constant 1.000000e+00 : f32
    %227 = vector.broadcast %cst_60 : f32 to vector<2x32xf32>
    %228 = arith.addf %227, %226 : vector<2x32xf32>
    %229 = arith.divf %227, %228 : vector<2x32xf32>
    %230 = vector.extract_strided_slice %217 {offsets = [0, 64], sizes = [2, 32], strides = [1, 1]} : vector<2x128xf32> to vector<2x32xf32>
    %231 = math.tanh %230 : vector<2x32xf32>
    %232 = vector.extract_strided_slice %217 {offsets = [0, 96], sizes = [2, 32], strides = [1, 1]} : vector<2x128xf32> to vector<2x32xf32>
    %233 = arith.negf %232 : vector<2x32xf32>
    %234 = math.exp %233 : vector<2x32xf32>
    %cst_61 = arith.constant 1.000000e+00 : f32
    %235 = vector.broadcast %cst_61 : f32 to vector<2x32xf32>
    %236 = arith.addf %235, %234 : vector<2x32xf32>
    %237 = arith.divf %235, %236 : vector<2x32xf32>
    %238 = arith.mulf %229, %209 : vector<2x32xf32>
    %239 = arith.mulf %223, %231 : vector<2x32xf32>
    %240 = arith.addf %238, %239 : vector<2x32xf32>
    %241 = math.tanh %240 : vector<2x32xf32>
    %242 = arith.mulf %237, %241 : vector<2x32xf32>
    %c7_i32 = arith.constant 7 : i32
    %243 = arith.index_cast %c7_i32 : i32 to index
    %c0_62 = arith.constant 0 : index
    %c0_63 = arith.constant 0 : index
    %244 = vector.load %arg10[%243, %c0_62, %c0_63] : memref<8x2x128xf32, #tpu.memory_space<vmem>>, vector<1x2x128xf32>
    %245 = vector.shape_cast %244 : vector<1x2x128xf32> to vector<2x128xf32>
    %246 = arith.truncf %242 : vector<2x32xf32> to vector<2x32xbf16>
    %cst_64 = arith.constant dense<0.000000e+00> : vector<2x128xf32>
    %247 = tpu.matmul %246, %23, %cst_64 {dimension_numbers = #tpu.dot_dimension_numbers<[1], [0], [0], [1], [0, 0, 1, 1], [], []>} : vector<2x32xbf16>, vector<32x128xbf16>, vector<2x128xf32> -> vector<2x128xf32>
    %248 = arith.addf %245, %247 : vector<2x128xf32>
    %249 = vector.extract_strided_slice %248 {offsets = [0, 0], sizes = [2, 32], strides = [1, 1]} : vector<2x128xf32> to vector<2x32xf32>
    %250 = arith.negf %249 : vector<2x32xf32>
    %251 = math.exp %250 : vector<2x32xf32>
    %cst_65 = arith.constant 1.000000e+00 : f32
    %252 = vector.broadcast %cst_65 : f32 to vector<2x32xf32>
    %253 = arith.addf %252, %251 : vector<2x32xf32>
    %254 = arith.divf %252, %253 : vector<2x32xf32>
    %255 = vector.extract_strided_slice %248 {offsets = [0, 32], sizes = [2, 32], strides = [1, 1]} : vector<2x128xf32> to vector<2x32xf32>
    %256 = arith.negf %255 : vector<2x32xf32>
    %257 = math.exp %256 : vector<2x32xf32>
    %cst_66 = arith.constant 1.000000e+00 : f32
    %258 = vector.broadcast %cst_66 : f32 to vector<2x32xf32>
    %259 = arith.addf %258, %257 : vector<2x32xf32>
    %260 = arith.divf %258, %259 : vector<2x32xf32>
    %261 = vector.extract_strided_slice %248 {offsets = [0, 64], sizes = [2, 32], strides = [1, 1]} : vector<2x128xf32> to vector<2x32xf32>
    %262 = math.tanh %261 : vector<2x32xf32>
    %263 = vector.extract_strided_slice %248 {offsets = [0, 96], sizes = [2, 32], strides = [1, 1]} : vector<2x128xf32> to vector<2x32xf32>
    %264 = arith.negf %263 : vector<2x32xf32>
    %265 = math.exp %264 : vector<2x32xf32>
    %cst_67 = arith.constant 1.000000e+00 : f32
    %266 = vector.broadcast %cst_67 : f32 to vector<2x32xf32>
    %267 = arith.addf %266, %265 : vector<2x32xf32>
    %268 = arith.divf %266, %267 : vector<2x32xf32>
    %269 = arith.mulf %260, %240 : vector<2x32xf32>
    %270 = arith.mulf %254, %262 : vector<2x32xf32>
    %271 = arith.addf %269, %270 : vector<2x32xf32>
    %272 = math.tanh %271 : vector<2x32xf32>
    %273 = arith.mulf %268, %272 : vector<2x32xf32>
    %c8_i32 = arith.constant 8 : i32
    %274 = arith.truncf %273 : vector<2x32xf32> to vector<2x32xbf16>
    %c0_68 = arith.constant 0 : index
    %c0_69 = arith.constant 0 : index
    %275 = vector.load %arg7[%c0_68, %c0_69] : memref<32x4xbf16, #tpu.memory_space<vmem>>, vector<32x4xbf16>
    %cst_70 = arith.constant dense<0.000000e+00> : vector<2x4xf32>
    %276 = tpu.matmul %274, %275, %cst_70 {dimension_numbers = #tpu.dot_dimension_numbers<[1], [0], [0], [1], [0, 0, 1, 1], [], []>} : vector<2x32xbf16>, vector<32x4xbf16>, vector<2x4xf32> -> vector<2x4xf32>
    %c0_71 = arith.constant 0 : index
    %c0_72 = arith.constant 0 : index
    %277 = vector.load %arg8[%c0_71, %c0_72] : memref<1x4xf32, #tpu.memory_space<vmem>>, vector<1x4xf32>
    %278 = vector.broadcast %277 : vector<1x4xf32> to vector<2x4xf32>
    %279 = arith.addf %276, %278 : vector<2x4xf32>
    %c0_73 = arith.constant 0 : index
    %c0_74 = arith.constant 0 : index
    %280 = vector.load %arg9[%c0_73, %c0_74] : memref<2x4xf32, #tpu.memory_space<vmem>>, vector<2x4xf32>
    tpu.vector_store %arg9[%c0_73, %c0_74], %279 {strides = array<i32>} : memref<2x4xf32, #tpu.memory_space<vmem>>, vector<2x4xf32>,
    return
  }
  func.func @transform_0(%arg0: i32) -> (i32, i32, i32) {
    %c0_i32 = arith.constant 0 : i32
    %c0_i32_0 = arith.constant 0 : i32
    %c0_i32_1 = arith.constant 0 : i32
    return %c0_i32, %arg0, %c0_i32_0 : i32, i32, i32
  }
  func.func @transform_1(%arg0: i32) -> (i32, i32) {
    %c0_i32 = arith.constant 0 : i32
    %c0_i32_0 = arith.constant 0 : i32
    %c0_i32_1 = arith.constant 0 : i32
    return %c0_i32, %c0_i32_0 : i32, i32
  }
  func.func @transform_2(%arg0: i32) -> (i32, i32) {
    %c0_i32 = arith.constant 0 : i32
    %c0_i32_0 = arith.constant 0 : i32
    %c0_i32_1 = arith.constant 0 : i32
    return %c0_i32, %c0_i32_0 : i32, i32
  }
  func.func @transform_3(%arg0: i32) -> (i32, i32) {
    %c0_i32 = arith.constant 0 : i32
    %c0_i32_0 = arith.constant 0 : i32
    %c0_i32_1 = arith.constant 0 : i32
    return %c0_i32, %c0_i32_0 : i32, i32
  }
  func.func @transform_4(%arg0: i32) -> (i32, i32) {
    %c0_i32 = arith.constant 0 : i32
    %c0_i32_0 = arith.constant 0 : i32
    %c0_i32_1 = arith.constant 0 : i32
    return %c0_i32, %c0_i32_0 : i32, i32
  }
  func.func @transform_5(%arg0: i32) -> (i32, i32) {
    %c0_i32 = arith.constant 0 : i32
    %c0_i32_0 = arith.constant 0 : i32
    %c0_i32_1 = arith.constant 0 : i32
    return %c0_i32, %c0_i32_0 : i32, i32
  }
  func.func @transform_6(%arg0: i32) -> (i32, i32) {
    %c0_i32 = arith.constant 0 : i32
    %c0_i32_0 = arith.constant 0 : i32
    %c0_i32_1 = arith.constant 0 : i32
    return %c0_i32, %c0_i32_0 : i32, i32
  }
  func.func @transform_7(%arg0: i32) -> (i32, i32) {
    %c0_i32 = arith.constant 0 : i32
    %c0_i32_0 = arith.constant 0 : i32
    %c0_i32_1 = arith.constant 0 : i32
    return %c0_i32, %c0_i32_0 : i32, i32
  }
  func.func @transform_8(%arg0: i32) -> (i32, i32) {
    %c0_i32 = arith.constant 0 : i32
    %c0_i32_0 = arith.constant 0 : i32
    return %arg0, %c0_i32 : i32, i32
  }
}

</mosaic_0001>

<bundles_post_ra>
// kernel: conv_lstm_classifier.1
= control target key start
LH: loop header
LB: loop body
LE: loop exit
PB: predicated region body
PF: predicated region fallthrough
CT: control target
= control target key end

     0   :  { %s1262_s0 = inlined_call_operand.vmem [shape: bf16[8,2,32], index: 0, kind: input, shape index: {}]   ;;  %s1263_s1 = inlined_call_operand.vmem [shape: bf16[96,32], index: 1, kind: input, shape index: {}]   ;;  %s1264_s2 = inlined_call_operand.vmem [shape: f32[1,32], index: 2, kind: input, shape index: {}]   ;;  %s1265_s3 = inlined_call_operand.vmem [shape: bf16[32,128], index: 3, kind: input, shape index: {}]   ;;  %s1266_s4 = inlined_call_operand.vmem [shape: bf16[32,128], index: 4, kind: input, shape index: {}]   ;;  %s1267_s5 = inlined_call_operand.vmem [shape: f32[1,128], index: 5, kind: input, shape index: {}]   ;;  %s1268_s6 = inlined_call_operand.vmem [shape: bf16[32,4], index: 6, kind: input, shape index: {}]   ;;  %s1269_s7 = inlined_call_operand.vmem [shape: f32[1,4], index: 7, kind: input, shape index: {}]   ;;  %s1270_s8 = inlined_call_operand.hbm [shape: f32[2,4], index: 8, kind: output, shape index: {}]  }
   0x1   :  { %v1084_v0 = vld [vmem:[%s1262_s0] sm:$0x1] }
   0x2   :  { %40 = vst [vmem:[#allocation1] ss:$9 sm:$0xff] %v1084_v0 }
   0x3   :  { %13 = vsyncpa [#allocation4], 0  ;;  %v1090_v1 = vld [vmem:[%s1262_s0 + $0x1] sm:$0x1]  ;;  %s1032_s9 = smov 32   ;;  %s1033_s22 = smov 64  }
   0x4   :  { %v1097_v3 = vld [vmem:[%s1262_s0 + $0x2] sm:$0x1]  ;;  %v1104_v5 = vld [vmem:[%s1262_s0 + $0x3] sm:$0x1]  ;;  %v1111_v7 = vld [vmem:[%s1262_s0 + $0x4] sm:$0x1] }
   0x5   :  { %v1118_v9 = vld [vmem:[%s1262_s0 + $0x5] sm:$0x1]  ;;  %v1125_v11 = vld [vmem:[%s1262_s0 + $0x6] sm:$0x1]  ;;  %v38_v13 = vld [vmem:[%s1262_s0 + $0x7] sm:$0x1] }
   0x6   :  { %v1034_v23 = vmov 0   ;;  %vm128_vm0 = vcmask 261120   ;;  %vm145_vm1 = vcmask 523264   ;;  %v928_v42 = vld [vmem:[%s1263_s1 + $0x28] sm:$0xff]  ;;  %v927_v43 = vld [vmem:[%s1263_s1 + $0x20] sm:$0xff]  ;;  %v926_v45 = vld [vmem:[%s1263_s1 + $0x18] sm:$0xff] }
   0x7   :  { %235 = vmatpush.bf16.msra.mxu0 %v928_v42  ;;  %v925_v48 = vld [vmem:[%s1263_s1 + $0x10] sm:$0xff]  ;;  %v924_v52 = vld [vmem:[%s1263_s1 + $0x8] sm:$0xff]  ;;  %v923_v53 = vld [vmem:[%s1263_s1] sm:$0xff]  ;;  %vm230_vm2 = vcmask 785408   ;;  %s1035_s25 = smov [#allocation3]   ;;  %s848_s29 = sshll.u32 %s1270_s8, 4  ;;  %s849_s29 = int_to_ptr.hbm [resolvable:$true] %s848_s29 }
   0x8   :  { %s846_s26 = sshll.u32 %s1035_s25, 4  ;;  %s847_s26 = int_to_ptr.vmem [resolvable:$true] %s846_s26 }
   0x9   :  { %v41_v2 = vld [vmem:[#allocation1] sm:$0xff] }
   0xa   :  { %71 = vrot.lane.b32.xlu0 %v41_v2, %s1032_s9  ;;  %44 = vst [vmem:[#allocation1] ss:$9 sm:$0xff] %v1090_v1  ;;  %v931_v2 = vld [vmem:[%s1266_s4] sm:$0xff] }
   0xb   :  { %236 = vmatpush.bf16.msra.mxu0 %v927_v43 }
   0xf   :  { %237 = vmatpush.bf16.msra.mxu0 %v926_v45 }
  0x11   :  { %v45_v4 = vld [vmem:[#allocation1] sm:$0xff] }
  0x12   :  { %48 = vst [vmem:[#allocation1] ss:$9 sm:$0xff] %v1097_v3  ;;  %73 = vrot.lane.b32.xlu0 %v45_v4, %s1032_s9 }
  0x13   :  { %238 = vmatpush.bf16.msra.mxu0 %v925_v48 }
  0x17   :  { %239 = vmatpush.bf16.msra.mxu0 %v924_v52 }
  0x19   :  { %v49_v6 = vld [vmem:[#allocation1] sm:$0xff] }
  0x1a   :  { %75 = vrot.lane.b32.xlu1 %v49_v6, %s1032_s9  ;;  %52 = vst [vmem:[#allocation1] ss:$9 sm:$0xff] %v1104_v5 }
  0x1b   :  { %240 = vmatpush.bf16.msra.mxu0 %v923_v53 }
  0x21   :  { %v53_v8 = vld [vmem:[#allocation1] sm:$0xff] }
  0x22   :  { %77 = vrot.lane.b32.xlu1 %v53_v8, %s1032_s9  ;;  %56 = vst [vmem:[#allocation1] ss:$9 sm:$0xff] %v1111_v7 }
  0x29   :  { %v57_v10 = vld [vmem:[#allocation1] sm:$0xff] }
  0x2a   :  { %60 = vst [vmem:[#allocation1] ss:$9 sm:$0xff] %v1118_v9  ;;  %79 = vrot.lane.b32.xlu2 %v57_v10, %s1032_s9 }
  0x31   :  { %v61_v12 = vld [vmem:[#allocation1] sm:$0xff] }
  0x32   :  { %64 = vst [vmem:[#allocation1] ss:$9 sm:$0xff] %v1125_v11  ;;  %81 = vrot.lane.b32.xlu2 %v61_v12, %s1032_s9 }
  0x39   :  { %v65_v14 = vld [vmem:[#allocation1] sm:$0xff] }
  0x3a   :  { %83 = vrot.lane.b32.xlu0 %v65_v14, %s1032_s9  ;;  %68 = vst [vmem:[#allocation1] ss:$9 sm:$0xff] %v38_v13  ;;  %v940_v14 = vld [vmem:[%s1267_s5] ss:$0 sm:$0xff] }
  0x41   :  { %v69_v15 = vld [vmem:[#allocation1] sm:$0xff] }
  0x42   :  { %85 = vrot.lane.b32.xlu1 %v69_v15, %s1032_s9  ;;  %87 = vst [vmem:[#allocation1] ss:$9 sm:$0xff] %v1090_v1 }
  0x49   :  { %v88_v16 = vld [vmem:[#allocation1] sm:$0xff] }
  0x4a   :  { %90 = vst [vmem:[#allocation1] ss:$9 sm:$0xff] %v1097_v3  ;;  %112 = vrot.lane.b32.xlu2 %v88_v16, %s1033_s22 }
  0x51   :  { %v91_v17 = vld [vmem:[#allocation1] sm:$0xff] }
  0x52   :  { %114 = vrot.lane.b32.xlu0 %v91_v17, %s1033_s22  ;;  %93 = vst [vmem:[#allocation1] ss:$9 sm:$0xff] %v1104_v5 }
  0x59   :  { %v94_v18 = vld [vmem:[#allocation1] sm:$0xff] }
  0x5a   :  { %116 = vrot.lane.b32.xlu1 %v94_v18, %s1033_s22  ;;  %96 = vst [vmem:[#allocation1] ss:$9 sm:$0xff] %v1111_v7 }
  0x61   :  { %v97_v19 = vld [vmem:[#allocation1] sm:$0xff] }
  0x62   :  { %99 = vst [vmem:[#allocation1] ss:$9 sm:$0xff] %v1118_v9  ;;  %118 = vrot.lane.b32.xlu2 %v97_v19, %s1033_s22 }
  0x69   :  { %v100_v20 = vld [vmem:[#allocation1] sm:$0xff] }
  0x6a   :  { %120 = vrot.lane.b32.xlu0 %v100_v20, %s1033_s22  ;;  %102 = vst [vmem:[#allocation1] ss:$9 sm:$0xff] %v1125_v11 }
  0x71   :  { %v103_v21 = vld [vmem:[#allocation1] sm:$0xff] }
  0x72   :  { %122 = vrot.lane.b32.xlu1 %v103_v21, %s1033_s22  ;;  %105 = vst [vmem:[#allocation1] ss:$9 sm:$0xff] %v38_v13 }
  0x79   :  { %v106_v22 = vld [vmem:[#allocation1] sm:$0xff] }
  0x7a   :  { %109 = vst [vmem:[#allocation1] ss:$9 sm:$0xff] %v1034_v23  ;;  %124 = vrot.lane.b32.xlu2 %v106_v22, %s1033_s22 }
  0x7c   :  { %v72_v27 = vpop.permute.xlu0 %71 }
  0x7d   :  { %v130_v28 = vsel %vm128_vm0, 0, %v72_v27 }
  0x81   :  { %v110_v24 = vld [vmem:[#allocation1] sm:$0xff] }
  0x82   :  { %126 = vrot.lane.b32.xlu0 %v110_v24, %s1033_s22 }
  0x84   :  { %v80_v25 = vpop.permute.xlu2 %79  ;;  %v74_v32 = vpop.permute.xlu0 %73 }
  0x85   :  { %v132_v38 = vsel %vm128_vm0, %v1084_v0, %v74_v32  ;;  %v138_v54 = vsel %vm128_vm0, %v1104_v5, %v80_v25  ;;  %v932_v0 = vld [vmem:[%s1266_s4 + $0x8] sm:$0xff]  ;;  %v939_v5 = vld [vmem:[%s1264_s2] ss:$0 sm:$0xff] }
  0x86   :  { %334 = vmatpush.bf16.msra.mxu2 %v932_v0  ;;  %394 = vmatpush.bf16.msra.mxu3 %v932_v0 }
  0x87   :  { %634 = vmatpush.bf16.msrb.mxu0 %v932_v0 }
  0x8a   :  { %335 = vmatpush.bf16.msra.mxu2 %v931_v2  ;;  %395 = vmatpush.bf16.msra.mxu3 %v931_v2 }
  0x8b   :  { %635 = vmatpush.bf16.msrb.mxu0 %v931_v2 }
  0x8c   :  { %v82_v26 = vpop.permute.xlu2 %81  ;;  %v76_v31 = vpop.permute.xlu1 %75 }
  0x8d   :  { %v134_v44 = vsel %vm128_vm0, %v1090_v1, %v76_v31  ;;  %v140_v57 = vsel %vm128_vm0, %v1111_v7, %v82_v26  ;;  %v930_v1 = vld [vmem:[%s1265_s3 + $0x8] sm:$0xff]  ;;  %336 = vmatmul.bf16.vlgmr.msra.gmra.mxu2 %v1034_v23 }
  0x8e   :  { %279 = vmatpush.bf16.msra.mxu1 %v930_v1  ;;  %514 = vmatpush.bf16.msrb.mxu2 %v932_v0 }
  0x8f   :  { %574 = vmatpush.bf16.msrb.mxu3 %v932_v0 }
  0x92   :  { %515 = vmatpush.bf16.msrb.mxu2 %v931_v2 }
  0x93   :  { %575 = vmatpush.bf16.msrb.mxu3 %v931_v2 }
  0x94   :  { %v78_v33 = vpop.permute.xlu1 %77 }
  0x95   :  { %v136_v34 = vsel %vm128_vm0, %v1097_v3, %v78_v33  ;;  %v929_v3 = vld [vmem:[%s1265_s3] sm:$0xff] }
  0x96   :  { %280 = vmatpush.bf16.msra.mxu1 %v929_v3  ;;  %754 = vmatpush.bf16.msra.mxu2 %v932_v0 }
  0x9a   :  { %454 = vmatpush.bf16.msrb.mxu1 %v932_v0  ;;  %755 = vmatpush.bf16.msra.mxu2 %v931_v2 }
  0x9e   :  { %455 = vmatpush.bf16.msrb.mxu1 %v931_v2 }
  0xa4   :  { %v113_v29 = vpop.permute.xlu2 %112 }
  0xa5   :  { %v147_v30 = vsel %vm145_vm1, %v130_v28, %v113_v29 }
  0xa6   :  { %178 = vst [vmem:[#allocation1] ss:$9 sm:$0xff] %v147_v30 }
  0xac   :  { %v84_v35 = vpop.permute.xlu0 %83 }
  0xad   :  { %v142_v49 = vsel %vm128_vm0, %v1118_v9, %v84_v35 }
  0xb4   :  { %v86_v39 = vpop.permute.xlu1 %85 }
  0xb5   :  { %v144_v60 = vsel %vm128_vm0, %v1125_v11, %v86_v39 }
  0xbc   :  { %v119_v36 = vpop.permute.xlu2 %118 }
  0xbd   :  { %v153_v37 = vsel %vm145_vm1, %v136_v34, %v119_v36 }
  0xbe   :  { %184 = vst [vmem:[#allocation1 + $0x3] ss:$9 sm:$0xff] %v153_v37 }
  0xc4   :  { %v115_v40 = vpop.permute.xlu0 %114 }
  0xc5   :  { %v149_v41 = vsel %vm145_vm1, %v132_v38, %v115_v40 }
  0xc6   :  { %180 = vst [vmem:[#allocation1 + $0x1] ss:$9 sm:$0xff] %v149_v41 }
  0xcc   :  { %v117_v46 = vpop.permute.xlu1 %116 }
  0xcd   :  { %v151_v47 = vsel %vm145_vm1, %v134_v44, %v117_v46 }
  0xce   :  { %182 = vst [vmem:[#allocation1 + $0x2] ss:$9 sm:$0xff] %v151_v47 }
  0xd4   :  { %v125_v50 = vpop.permute.xlu2 %124 }
  0xd5   :  { %v159_v51 = vsel %vm145_vm1, %v142_v49, %v125_v50 }
  0xd6   :  { %190 = vst [vmem:[#allocation1 + $0x6] ss:$9 sm:$0xff] %v159_v51 }
  0xdc   :  { %v121_v55 = vpop.permute.xlu0 %120 }
  0xdd   :  { %v155_v56 = vsel %vm145_vm1, %v138_v54, %v121_v55 }
  0xde   :  { %186 = vst [vmem:[#allocation1 + $0x4] ss:$9 sm:$0xff] %v155_v56 }
  0xe4   :  { %v123_v58 = vpop.permute.xlu1 %122 }
  0xe5   :  { %v157_v59 = vsel %vm145_vm1, %v140_v57, %v123_v58 }
  0xe6   :  { %188 = vst [vmem:[#allocation1 + $0x5] ss:$9 sm:$0xff] %v157_v59 }
  0xf4   :  { %v127_v61 = vpop.permute.xlu0 %126 }
  0xf5   :  { %v161_v62 = vsel %vm145_vm1, %v144_v60, %v127_v61 }
  0xf6   :  { %192 = vst [vmem:[#allocation1 + $0x7] ss:$9 sm:$0xff] %v161_v62 }
  0xfd   :  { %v193_v63 = vld [vmem:[#allocation1] sm:$0xff] }
  0xfe   :  { %881 = vmatmul.msk.bf16.vlgmr.msra.gmra.mxu0 %vm230_vm2, %v193_v63 }
 0x110   :  { %v337_v12 = vpop.f32.mrf.mxu2 }
 0x118   :  { %v339_v13 = vpop.f32.mrf.mxu2 }
 0x17b   :  { %v242_v4 = vpop.f32.mrf.mxu0 }
 0x17c   :  { %v243_v6 = vadd.f32 %v939_v5, %v242_v4 }
 0x17e   :  { %v247_v9 = vmax.f32 %v243_v6, 0.0 }
 0x183   :  { %v244_v7 = vpop.f32.mrf.mxu0 }
 0x184   :  { %v245_v8 = vadd.f32 %v939_v5, %v244_v7 }
 0x186   :  { %v248_v10 = vmax.f32 %v245_v8, 0.0 }
 0x188   :  { %v249_v11 = vpack.c.bf16 %v248_v10, %v247_v9 }
 0x18a   :  { %890 = vmatmul.msk.bf16.vlgmr.msra.gmra.mxu1 %vm128_vm0, %v249_v11 }
 0x18b   :  { %694 = vmatpush.bf16.msra.mxu1 %v932_v0 }
 0x18f   :  { %695 = vmatpush.bf16.msra.mxu1 %v931_v2 }
 0x207   :  { %v282_v15 = vpop.f32.mrf.mxu1 }
 0x208   :  { %v283_v16 = vadd.f32 %v940_v14, %v282_v15 }
 0x20a   :  { %v289_v17 = vrot.slane %v283_v16, 2  ;;  %v290_v18 = vrot.slane %v283_v16, 4  ;;  %v291_v19 = vrot.slane %v283_v16, 6  ;;  %301 = vst [vmem:[#allocation2] sm:$0x3] %v283_v16 }
 0x20c   :  { %302 = vst [vmem:[#allocation2 + $0x2] sm:$0x3] %v289_v17 }
 0x20d   :  { %303 = vst [vmem:[#allocation2 + $0x4] sm:$0x3] %v290_v18 }
 0x20e   :  { %304 = vst [vmem:[#allocation2 + $0x6] sm:$0x3] %v291_v19 }
 0x20f   :  { %v284_v20 = vpop.f32.mrf.mxu1 }
 0x210   :  { %v285_v21 = vadd.f32 %v940_v14, %v284_v20 }
 0x211   :  { %v313_v22 = vld [vmem:[#allocation2] sm:$0x3] }
 0x212   :  { %v341_v23 = vadd.f32 %v337_v12, %v313_v22  ;;  %v292_v24 = vrot.slane %v285_v21, 2  ;;  %v293_v25 = vrot.slane %v285_v21, 4  ;;  %v294_v26 = vrot.slane %v285_v21, 6  ;;  %305 = vst [vmem:[#allocation2 + $0x8] sm:$0x3] %v285_v21 }
 0x213   :  { %v380_v51 = vld [vmem:[#allocation2 + $0x2] sm:$0x3] }
 0x214   :  { %942 = vtanh.f32 %v341_v23  ;;  %306 = vst [vmem:[#allocation2 + $0xa] sm:$0x3] %v292_v24  ;;  %v899_v28 = vmul.f32 -1.442695, %v341_v23  ;;  %v440_v15 = vld [vmem:[#allocation2 + $0x4] sm:$0x3] }
 0x215   :  { %307 = vst [vmem:[#allocation2 + $0xc] sm:$0x3] %v293_v25 }
 0x216   :  { %308 = vst [vmem:[#allocation2 + $0xe] sm:$0x3] %v294_v26  ;;  %944 = vpow2.f32 %v899_v28 }
 0x21a   :  { %v943_v27 = vpop.eup %942 }
 0x21b   :  { %364 = vrot.lane.b32.xlu1 %v943_v27, %s1033_s22 }
 0x21c   :  { %v945_v29 = vpop.eup %944 }
 0x21d   :  { %v345_v30 = vadd.f32 1.0, %v945_v29 }
 0x21f   :  { %946 = vrcp.f32 %v345_v30  ;;  %v357_v36 = vand.u32 2147483648, %v345_v30  ;;  %vm351_vm4 = vweird.f32 %v345_v30  ;;  %v355_v37 = vand.u32 2147483647, %v345_v30 }
 0x221   :  { %v358_v39 = vor.u32 1.1754944e-38, %v357_v36  ;;  %vm356_vm6 = vcmp.eq.f32.partialorder %v355_v37, 8.507059e+37 }
 0x225   :  { %v947_v31 = vpop.eup %946 }
 0x226   :  { %v347_v32 = vmul.f32 %v947_v31, %v345_v30  ;;  %vm352_vm3 = vweird.f32 %v947_v31 }
 0x227   :  { %vm353_vm5 = vmor %vm351_vm4, %vm352_vm3 }
 0x228   :  { %v348_v33 = vsub.f32 1.0, %v347_v32 }
 0x22a   :  { %v349_v34 = vmul.f32 %v947_v31, %v348_v33 }
 0x22c   :  { %v350_v35 = vadd.f32 %v947_v31, %v349_v34 }
 0x22e   :  { %v354_v38 = vsel %vm353_vm5, %v947_v31, %v350_v35 }
 0x22f   :  { %v359_v41 = vsel %vm356_vm6, %v358_v39, %v354_v38 }
 0x230   :  { %v362_v43 = vmul.f32 0.0, %v359_v41 }
 0x28d   :  { %v365_v40 = vpop.permute.xlu1 %364 }
 0x28e   :  { %v367_v42 = vmul.f32 %v365_v40, %v359_v41 }
 0x290   :  { %369 = vrot.lane.b32.xlu2 %v367_v42, %s1032_s9 }
 0x2ea   :  { %v370_v44 = vpop.permute.xlu2 %369 }
 0x2eb   :  { %v372_v45 = vadd.f32 %v370_v44, %v362_v43  ;;  %v500_v43 = vld [vmem:[#allocation2 + $0x6] sm:$0x3] }
 0x2ed   :  { %948 = vtanh.f32 %v372_v45 }
 0x2f3   :  { %v949_v46 = vpop.eup %948 }
 0x2f4   :  { %375 = vrot.lane.b32.xlu0 %v949_v46, %s1033_s22 }
 0x366   :  { %v376_v47 = vpop.permute.xlu0 %375 }
 0x367   :  { %v378_v48 = vmul.f32 %v376_v47, %v359_v41 }
 0x369   :  { %v381_v49 = vpack.c.bf16 %v378_v48, %v378_v48 }
 0x36b   :  { %383 = vrot.lane.b32.xlu1 %v381_v49, %s1032_s9 }
 0x3dd   :  { %v384_v50 = vpop.permute.xlu1 %383 }
 0x3de   :  { %900 = vmatmul.msk.bf16.vlgmr.msra.gmra.mxu3 %vm128_vm0, %v384_v50 }
 0x461   :  { %v397_v52 = vpop.f32.mrf.mxu3 }
 0x462   :  { %v401_v53 = vadd.f32 %v397_v52, %v380_v51 }
 0x464   :  { %950 = vtanh.f32 %v401_v53  ;;  %v901_v56 = vmul.f32 -1.442695, %v401_v53 }
 0x466   :  { %952 = vpow2.f32 %v901_v56 }
 0x469   :  { %v399_v54 = vpop.f32.mrf.mxu3 }
 0x46a   :  { %v951_v55 = vpop.eup %950 }
 0x46b   :  { %424 = vrot.lane.b32.xlu2 %v951_v55, %s1033_s22 }
 0x46c   :  { %v953_v57 = vpop.eup %952 }
 0x46d   :  { %v405_v58 = vadd.f32 1.0, %v953_v57 }
 0x46f   :  { %954 = vrcp.f32 %v405_v58  ;;  %v417_v0 = vand.u32 2147483648, %v405_v58  ;;  %vm411_vm8 = vweird.f32 %v405_v58  ;;  %v415_v1 = vand.u32 2147483647, %v405_v58 }
 0x471   :  { %v418_v3 = vor.u32 1.1754944e-38, %v417_v0  ;;  %vm416_vm10 = vcmp.eq.f32.partialorder %v415_v1, 8.507059e+37 }
 0x475   :  { %v955_v59 = vpop.eup %954 }
 0x476   :  { %v407_v60 = vmul.f32 %v955_v59, %v405_v58  ;;  %vm412_vm7 = vweird.f32 %v955_v59 }
 0x477   :  { %vm413_vm9 = vmor %vm411_vm8, %vm412_vm7 }
 0x478   :  { %v408_v61 = vsub.f32 1.0, %v407_v60 }
 0x47a   :  { %v409_v62 = vmul.f32 %v955_v59, %v408_v61 }
 0x47c   :  { %v410_v63 = vadd.f32 %v955_v59, %v409_v62 }
 0x47e   :  { %v414_v2 = vsel %vm413_vm9, %v955_v59, %v410_v63 }
 0x47f   :  { %v419_v5 = vsel %vm416_vm10, %v418_v3, %v414_v2 }
 0x480   :  { %v422_v7 = vmul.f32 %v419_v5, %v372_v45 }
 0x4c5   :  { %v425_v4 = vpop.permute.xlu2 %424 }
 0x4c6   :  { %v427_v6 = vmul.f32 %v425_v4, %v419_v5 }
 0x4c8   :  { %429 = vrot.lane.b32.xlu0 %v427_v6, %s1032_s9 }
 0x53a   :  { %v430_v8 = vpop.permute.xlu0 %429 }
 0x53b   :  { %v432_v9 = vadd.f32 %v430_v8, %v422_v7  ;;  %v560_v7 = vld [vmem:[#allocation2 + $0x8] sm:$0x3] }
 0x53d   :  { %956 = vtanh.f32 %v432_v9 }
 0x543   :  { %v957_v10 = vpop.eup %956 }
 0x544   :  { %435 = vrot.lane.b32.xlu1 %v957_v10, %s1033_s22 }
 0x5b6   :  { %v436_v11 = vpop.permute.xlu1 %435 }
 0x5b7   :  { %v438_v12 = vmul.f32 %v436_v11, %v419_v5 }
 0x5b9   :  { %v441_v13 = vpack.c.bf16 %v438_v12, %v438_v12 }
 0x5bb   :  { %443 = vrot.lane.b32.xlu2 %v441_v13, %s1032_s9 }
 0x615   :  { %v444_v14 = vpop.permute.xlu2 %443 }
 0x616   :  { %902 = vmatmul.msk.bf16.vlgmr.msrb.gmra.mxu1 %vm128_vm0, %v444_v14 }
 0x693   :  { %v457_v16 = vpop.f32.mrf.mxu1 }
 0x694   :  { %v461_v17 = vadd.f32 %v457_v16, %v440_v15 }
 0x696   :  { %958 = vtanh.f32 %v461_v17  ;;  %v903_v20 = vmul.f32 -1.442695, %v461_v17 }
 0x698   :  { %960 = vpow2.f32 %v903_v20 }
 0x69b   :  { %v459_v18 = vpop.f32.mrf.mxu1 }
 0x69c   :  { %v959_v19 = vpop.eup %958 }
 0x69d   :  { %484 = vrot.lane.b32.xlu0 %v959_v19, %s1033_s22 }
 0x69e   :  { %v961_v21 = vpop.eup %960 }
 0x69f   :  { %v465_v22 = vadd.f32 1.0, %v961_v21 }
 0x6a1   :  { %962 = vrcp.f32 %v465_v22  ;;  %v477_v28 = vand.u32 2147483648, %v465_v22  ;;  %vm471_vm12 = vweird.f32 %v465_v22  ;;  %v475_v29 = vand.u32 2147483647, %v465_v22 }
 0x6a3   :  { %v478_v31 = vor.u32 1.1754944e-38, %v477_v28  ;;  %vm476_vm14 = vcmp.eq.f32.partialorder %v475_v29, 8.507059e+37 }
 0x6a7   :  { %v963_v23 = vpop.eup %962 }
 0x6a8   :  { %v467_v24 = vmul.f32 %v963_v23, %v465_v22  ;;  %vm472_vm11 = vweird.f32 %v963_v23 }
 0x6a9   :  { %vm473_vm13 = vmor %vm471_vm12, %vm472_vm11 }
 0x6aa   :  { %v468_v25 = vsub.f32 1.0, %v467_v24 }
 0x6ac   :  { %v469_v26 = vmul.f32 %v963_v23, %v468_v25 }
 0x6ae   :  { %v470_v27 = vadd.f32 %v963_v23, %v469_v26 }
 0x6b0   :  { %v474_v30 = vsel %vm473_vm13, %v963_v23, %v470_v27 }
 0x6b1   :  { %v479_v33 = vsel %vm476_vm14, %v478_v31, %v474_v30 }
 0x6b2   :  { %v482_v35 = vmul.f32 %v479_v33, %v432_v9 }
 0x70f   :  { %v485_v32 = vpop.permute.xlu0 %484 }
 0x710   :  { %v487_v34 = vmul.f32 %v485_v32, %v479_v33 }
 0x712   :  { %489 = vrot.lane.b32.xlu1 %v487_v34, %s1032_s9 }
 0x784   :  { %v490_v36 = vpop.permute.xlu1 %489 }
 0x785   :  { %v492_v37 = vadd.f32 %v490_v36, %v482_v35  ;;  %v620_v35 = vld [vmem:[#allocation2 + $0xa] sm:$0x3] }
 0x787   :  { %964 = vtanh.f32 %v492_v37 }
 0x78d   :  { %v965_v38 = vpop.eup %964 }
 0x78e   :  { %495 = vrot.lane.b32.xlu2 %v965_v38, %s1033_s22 }
 0x7e8   :  { %v496_v39 = vpop.permute.xlu2 %495 }
 0x7e9   :  { %v498_v40 = vmul.f32 %v496_v39, %v479_v33 }
 0x7eb   :  { %v501_v41 = vpack.c.bf16 %v498_v40, %v498_v40 }
 0x7ed   :  { %503 = vrot.lane.b32.xlu0 %v501_v41, %s1032_s9 }
 0x85f   :  { %v504_v42 = vpop.permute.xlu0 %503 }
 0x860   :  { %904 = vmatmul.msk.bf16.vlgmr.msrb.gmra.mxu2 %vm128_vm0, %v504_v42 }
 0x8e3   :  { %v517_v44 = vpop.f32.mrf.mxu2 }
 0x8e4   :  { %v521_v45 = vadd.f32 %v517_v44, %v500_v43 }
 0x8e6   :  { %966 = vtanh.f32 %v521_v45  ;;  %v905_v48 = vmul.f32 -1.442695, %v521_v45 }
 0x8e8   :  { %968 = vpow2.f32 %v905_v48 }
 0x8eb   :  { %v519_v46 = vpop.f32.mrf.mxu2 }
 0x8ec   :  { %v967_v47 = vpop.eup %966 }
 0x8ed   :  { %544 = vrot.lane.b32.xlu1 %v967_v47, %s1033_s22 }
 0x8ee   :  { %v969_v49 = vpop.eup %968 }
 0x8ef   :  { %v525_v50 = vadd.f32 1.0, %v969_v49 }
 0x8f1   :  { %970 = vrcp.f32 %v525_v50  ;;  %v537_v56 = vand.u32 2147483648, %v525_v50  ;;  %vm531_vm1 = vweird.f32 %v525_v50  ;;  %v535_v57 = vand.u32 2147483647, %v525_v50 }
 0x8f3   :  { %v538_v59 = vor.u32 1.1754944e-38, %v537_v56  ;;  %vm536_vm3 = vcmp.eq.f32.partialorder %v535_v57, 8.507059e+37 }
 0x8f7   :  { %v971_v51 = vpop.eup %970 }
 0x8f8   :  { %v527_v52 = vmul.f32 %v971_v51, %v525_v50  ;;  %vm532_vm15 = vweird.f32 %v971_v51 }
 0x8f9   :  { %vm533_vm2 = vmor %vm531_vm1, %vm532_vm15 }
 0x8fa   :  { %v528_v53 = vsub.f32 1.0, %v527_v52 }
 0x8fc   :  { %v529_v54 = vmul.f32 %v971_v51, %v528_v53 }
 0x8fe   :  { %v530_v55 = vadd.f32 %v971_v51, %v529_v54 }
 0x900   :  { %v534_v58 = vsel %vm533_vm2, %v971_v51, %v530_v55 }
 0x901   :  { %v539_v61 = vsel %vm536_vm3, %v538_v59, %v534_v58 }
 0x902   :  { %v542_v63 = vmul.f32 %v539_v61, %v492_v37 }
 0x95f   :  { %v545_v60 = vpop.permute.xlu1 %544 }
 0x960   :  { %v547_v62 = vmul.f32 %v545_v60, %v539_v61 }
 0x962   :  { %549 = vrot.lane.b32.xlu2 %v547_v62, %s1032_s9 }
 0x9bc   :  { %v550_v0 = vpop.permute.xlu2 %549 }
 0x9bd   :  { %v552_v1 = vadd.f32 %v550_v0, %v542_v63  ;;  %v680_v63 = vld [vmem:[#allocation2 + $0xc] sm:$0x3] }
 0x9bf   :  { %972 = vtanh.f32 %v552_v1 }
 0x9c5   :  { %v973_v2 = vpop.eup %972 }
 0x9c6   :  { %555 = vrot.lane.b32.xlu0 %v973_v2, %s1033_s22 }
 0xa38   :  { %v556_v3 = vpop.permute.xlu0 %555 }
 0xa39   :  { %v558_v4 = vmul.f32 %v556_v3, %v539_v61 }
 0xa3b   :  { %v561_v5 = vpack.c.bf16 %v558_v4, %v558_v4 }
 0xa3d   :  { %563 = vrot.lane.b32.xlu1 %v561_v5, %s1032_s9 }
 0xaaf   :  { %v564_v6 = vpop.permute.xlu1 %563 }
 0xab0   :  { %906 = vmatmul.msk.bf16.vlgmr.msrb.gmra.mxu3 %vm128_vm0, %v564_v6 }
 0xb33   :  { %v577_v8 = vpop.f32.mrf.mxu3 }
 0xb34   :  { %v581_v9 = vadd.f32 %v577_v8, %v560_v7 }
 0xb36   :  { %974 = vtanh.f32 %v581_v9  ;;  %v907_v12 = vmul.f32 -1.442695, %v581_v9 }
 0xb38   :  { %976 = vpow2.f32 %v907_v12 }
 0xb3b   :  { %v579_v10 = vpop.f32.mrf.mxu3 }
 0xb3c   :  { %v975_v11 = vpop.eup %974 }
 0xb3d   :  { %604 = vrot.lane.b32.xlu2 %v975_v11, %s1033_s22 }
 0xb3e   :  { %v977_v13 = vpop.eup %976 }
 0xb3f   :  { %v585_v14 = vadd.f32 1.0, %v977_v13 }
 0xb41   :  { %978 = vrcp.f32 %v585_v14  ;;  %v597_v20 = vand.u32 2147483648, %v585_v14  ;;  %vm591_vm5 = vweird.f32 %v585_v14  ;;  %v595_v21 = vand.u32 2147483647, %v585_v14 }
 0xb43   :  { %v598_v23 = vor.u32 1.1754944e-38, %v597_v20  ;;  %vm596_vm7 = vcmp.eq.f32.partialorder %v595_v21, 8.507059e+37 }
 0xb47   :  { %v979_v15 = vpop.eup %978 }
 0xb48   :  { %v587_v16 = vmul.f32 %v979_v15, %v585_v14  ;;  %vm592_vm4 = vweird.f32 %v979_v15 }
 0xb49   :  { %vm593_vm6 = vmor %vm591_vm5, %vm592_vm4  ;;  %vm839_vm5 = vcmask 25600  }
 0xb4a   :  { %v588_v17 = vsub.f32 1.0, %v587_v16 }
 0xb4c   :  { %v589_v18 = vmul.f32 %v979_v15, %v588_v17 }
 0xb4e   :  { %v590_v19 = vadd.f32 %v979_v15, %v589_v18 }
 0xb50   :  { %v594_v22 = vsel %vm593_vm6, %v979_v15, %v590_v19 }
 0xb51   :  { %v599_v25 = vsel %vm596_vm7, %v598_v23, %v594_v22 }
 0xb52   :  { %v602_v27 = vmul.f32 %v599_v25, %v552_v1 }
 0xb97   :  { %v605_v24 = vpop.permute.xlu2 %604 }
 0xb98   :  { %v607_v26 = vmul.f32 %v605_v24, %v599_v25 }
 0xb9a   :  { %609 = vrot.lane.b32.xlu0 %v607_v26, %s1032_s9 }
 0xc0c   :  { %v610_v28 = vpop.permute.xlu0 %609 }
 0xc0d   :  { %v612_v29 = vadd.f32 %v610_v28, %v602_v27  ;;  %v740_v27 = vld [vmem:[#allocation2 + $0xe] sm:$0x3] }
 0xc0f   :  { %980 = vtanh.f32 %v612_v29 }
 0xc15   :  { %v981_v30 = vpop.eup %980 }
 0xc16   :  { %615 = vrot.lane.b32.xlu1 %v981_v30, %s1033_s22 }
 0xc88   :  { %v616_v31 = vpop.permute.xlu1 %615 }
 0xc89   :  { %v618_v32 = vmul.f32 %v616_v31, %v599_v25 }
 0xc8b   :  { %v621_v33 = vpack.c.bf16 %v618_v32, %v618_v32 }
 0xc8d   :  { %623 = vrot.lane.b32.xlu2 %v621_v33, %s1032_s9 }
 0xce7   :  { %v624_v34 = vpop.permute.xlu2 %623 }
 0xce8   :  { %908 = vmatmul.msk.bf16.vlgmr.msrb.gmra.mxu0 %vm128_vm0, %v624_v34 }
 0xd65   :  { %v637_v36 = vpop.f32.mrf.mxu0 }
 0xd66   :  { %v641_v37 = vadd.f32 %v637_v36, %v620_v35 }
 0xd68   :  { %982 = vtanh.f32 %v641_v37  ;;  %v909_v40 = vmul.f32 -1.442695, %v641_v37 }
 0xd6a   :  { %984 = vpow2.f32 %v909_v40 }
 0xd6d   :  { %v639_v38 = vpop.f32.mrf.mxu0 }
 0xd6e   :  { %v983_v39 = vpop.eup %982 }
 0xd6f   :  { %664 = vrot.lane.b32.xlu0 %v983_v39, %s1033_s22 }
 0xd70   :  { %v985_v41 = vpop.eup %984 }
 0xd71   :  { %v645_v42 = vadd.f32 1.0, %v985_v41 }
 0xd73   :  { %986 = vrcp.f32 %v645_v42  ;;  %v657_v48 = vand.u32 2147483648, %v645_v42  ;;  %vm651_vm9 = vweird.f32 %v645_v42  ;;  %v655_v49 = vand.u32 2147483647, %v645_v42 }
 0xd75   :  { %v658_v51 = vor.u32 1.1754944e-38, %v657_v48  ;;  %vm656_vm11 = vcmp.eq.f32.partialorder %v655_v49, 8.507059e+37 }
 0xd79   :  { %v987_v43 = vpop.eup %986 }
 0xd7a   :  { %v647_v44 = vmul.f32 %v987_v43, %v645_v42  ;;  %vm652_vm8 = vweird.f32 %v987_v43 }
 0xd7b   :  { %vm653_vm10 = vmor %vm651_vm9, %vm652_vm8 }
 0xd7c   :  { %v648_v45 = vsub.f32 1.0, %v647_v44 }
 0xd7e   :  { %v649_v46 = vmul.f32 %v987_v43, %v648_v45 }
 0xd80   :  { %v650_v47 = vadd.f32 %v987_v43, %v649_v46 }
 0xd82   :  { %v654_v50 = vsel %vm653_vm10, %v987_v43, %v650_v47 }
 0xd83   :  { %v659_v53 = vsel %vm656_vm11, %v658_v51, %v654_v50  ;;  %v934_v51 = vld [vmem:[%s1268_s6 + $0x8] sm:$0xff] }
 0xd84   :  { %v662_v55 = vmul.f32 %v659_v53, %v612_v29  ;;  %832 = vmatpush.bf16.msra.mxu3 %v934_v51 }
 0xde1   :  { %v665_v52 = vpop.permute.xlu0 %664 }
 0xde2   :  { %v667_v54 = vmul.f32 %v665_v52, %v659_v53  ;;  %v933_v52 = vld [vmem:[%s1268_s6] sm:$0xff] }
 0xde3   :  { %833 = vmatpush.bf16.msra.mxu3 %v933_v52 }
 0xde4   :  { %669 = vrot.lane.b32.xlu1 %v667_v54, %s1032_s9 }
 0xe56   :  { %v670_v56 = vpop.permute.xlu1 %669 }
 0xe57   :  { %v672_v57 = vadd.f32 %v670_v56, %v662_v55 }
 0xe59   :  { %988 = vtanh.f32 %v672_v57 }
 0xe5f   :  { %v989_v58 = vpop.eup %988 }
 0xe60   :  { %675 = vrot.lane.b32.xlu2 %v989_v58, %s1033_s22 }
 0xeba   :  { %v676_v59 = vpop.permute.xlu2 %675 }
 0xebb   :  { %v678_v60 = vmul.f32 %v676_v59, %v659_v53 }
 0xebd   :  { %v681_v61 = vpack.c.bf16 %v678_v60, %v678_v60 }
 0xebf   :  { %683 = vrot.lane.b32.xlu0 %v681_v61, %s1032_s9 }
 0xf31   :  { %v684_v62 = vpop.permute.xlu0 %683 }
 0xf32   :  { %910 = vmatmul.msk.bf16.vlgmr.msra.gmra.mxu1 %vm128_vm0, %v684_v62 }
 0xfaf   :  { %v697_v0 = vpop.f32.mrf.mxu1 }
 0xfb0   :  { %v701_v1 = vadd.f32 %v697_v0, %v680_v63 }
 0xfb2   :  { %990 = vtanh.f32 %v701_v1  ;;  %v911_v4 = vmul.f32 -1.442695, %v701_v1 }
 0xfb4   :  { %992 = vpow2.f32 %v911_v4 }
 0xfb7   :  { %v699_v2 = vpop.f32.mrf.mxu1 }
 0xfb8   :  { %v991_v3 = vpop.eup %990 }
 0xfb9   :  { %724 = vrot.lane.b32.xlu1 %v991_v3, %s1033_s22 }
 0xfba   :  { %v993_v5 = vpop.eup %992 }
 0xfbb   :  { %v705_v6 = vadd.f32 1.0, %v993_v5 }
 0xfbd   :  { %994 = vrcp.f32 %v705_v6  ;;  %v717_v12 = vand.u32 2147483648, %v705_v6  ;;  %vm711_vm13 = vweird.f32 %v705_v6  ;;  %v715_v13 = vand.u32 2147483647, %v705_v6 }
 0xfbf   :  { %v718_v15 = vor.u32 1.1754944e-38, %v717_v12  ;;  %vm716_vm15 = vcmp.eq.f32.partialorder %v715_v13, 8.507059e+37 }
 0xfc3   :  { %v995_v7 = vpop.eup %994 }
 0xfc4   :  { %v707_v8 = vmul.f32 %v995_v7, %v705_v6  ;;  %vm712_vm12 = vweird.f32 %v995_v7 }
 0xfc5   :  { %vm713_vm14 = vmor %vm711_vm13, %vm712_vm12 }
 0xfc6   :  { %v708_v9 = vsub.f32 1.0, %v707_v8 }
 0xfc8   :  { %v709_v10 = vmul.f32 %v995_v7, %v708_v9 }
 0xfca   :  { %v710_v11 = vadd.f32 %v995_v7, %v709_v10 }
 0xfcc   :  { %v714_v14 = vsel %vm713_vm14, %v995_v7, %v710_v11 }
 0xfcd   :  { %v719_v17 = vsel %vm716_vm15, %v718_v15, %v714_v14 }
 0xfce   :  { %v722_v19 = vmul.f32 %v719_v17, %v672_v57  ;;  %v941_v57 = vld [vmem:[%s1269_s7] ss:$0 sm:$0xff] }
0x102b   :  { %v725_v16 = vpop.permute.xlu1 %724 }
0x102c   :  { %v727_v18 = vmul.f32 %v725_v16, %v719_v17 }
0x102e   :  { %729 = vrot.lane.b32.xlu2 %v727_v18, %s1032_s9 }
0x1088   :  { %v730_v20 = vpop.permute.xlu2 %729 }
0x1089   :  { %v732_v21 = vadd.f32 %v730_v20, %v722_v19 }
0x108b   :  { %996 = vtanh.f32 %v732_v21 }
0x1091   :  { %v997_v22 = vpop.eup %996 }
0x1092   :  { %735 = vrot.lane.b32.xlu0 %v997_v22, %s1033_s22 }
0x1104   :  { %v736_v23 = vpop.permute.xlu0 %735 }
0x1105   :  { %v738_v24 = vmul.f32 %v736_v23, %v719_v17 }
0x1107   :  { %v741_v25 = vpack.c.bf16 %v738_v24, %v738_v24 }
0x1109   :  { %743 = vrot.lane.b32.xlu1 %v741_v25, %s1032_s9 }
0x117b   :  { %v744_v26 = vpop.permute.xlu1 %743 }
0x117c   :  { %912 = vmatmul.msk.bf16.vlgmr.msra.gmra.mxu2 %vm128_vm0, %v744_v26 }
0x11ff   :  { %v757_v28 = vpop.f32.mrf.mxu2 }
0x1200   :  { %v761_v29 = vadd.f32 %v757_v28, %v740_v27 }
0x1202   :  { %998 = vtanh.f32 %v761_v29  ;;  %v913_v32 = vmul.f32 -1.442695, %v761_v29 }
0x1204   :  { %1000 = vpow2.f32 %v913_v32 }
0x1207   :  { %v759_v30 = vpop.f32.mrf.mxu2 }
0x1208   :  { %v999_v31 = vpop.eup %998 }
0x1209   :  { %784 = vrot.lane.b32.xlu2 %v999_v31, %s1033_s22 }
0x120a   :  { %v1001_v33 = vpop.eup %1000 }
0x120b   :  { %v765_v34 = vadd.f32 1.0, %v1001_v33 }
0x120d   :  { %1002 = vrcp.f32 %v765_v34  ;;  %v777_v40 = vand.u32 2147483648, %v765_v34  ;;  %vm771_vm2 = vweird.f32 %v765_v34  ;;  %v775_v41 = vand.u32 2147483647, %v765_v34 }
0x120f   :  { %v778_v43 = vor.u32 1.1754944e-38, %v777_v40  ;;  %vm776_vm4 = vcmp.eq.f32.partialorder %v775_v41, 8.507059e+37 }
0x1213   :  { %v1003_v35 = vpop.eup %1002 }
0x1214   :  { %v767_v36 = vmul.f32 %v1003_v35, %v765_v34  ;;  %vm772_vm1 = vweird.f32 %v1003_v35 }
0x1215   :  { %vm773_vm3 = vmor %vm771_vm2, %vm772_vm1 }
0x1216   :  { %v768_v37 = vsub.f32 1.0, %v767_v36 }
0x1218   :  { %v769_v38 = vmul.f32 %v1003_v35, %v768_v37 }
0x121a   :  { %v770_v39 = vadd.f32 %v1003_v35, %v769_v38 }
0x121c   :  { %v774_v42 = vsel %vm773_vm3, %v1003_v35, %v770_v39 }
0x121d   :  { %v779_v45 = vsel %vm776_vm4, %v778_v43, %v774_v42 }
0x121e   :  { %v782_v47 = vmul.f32 %v779_v45, %v732_v21 }
0x1263   :  { %v785_v44 = vpop.permute.xlu2 %784 }
0x1264   :  { %v787_v46 = vmul.f32 %v785_v44, %v779_v45 }
0x1266   :  { %789 = vrot.lane.b32.xlu0 %v787_v46, %s1032_s9 }
0x12d8   :  { %v790_v48 = vpop.permute.xlu0 %789 }
0x12d9   :  { %v792_v49 = vadd.f32 %v790_v48, %v782_v47 }
0x12db   :  { %1004 = vtanh.f32 %v792_v49 }
0x12e1   :  { %v1005_v50 = vpop.eup %1004 }
0x12e2   :  { %795 = vrot.lane.b32.xlu1 %v1005_v50, %s1033_s22 }
0x1354   :  { %v796_v53 = vpop.permute.xlu1 %795 }
0x1355   :  { %v798_v54 = vmul.f32 %v796_v53, %v779_v45 }
0x1357   :  { %v799_v55 = vpack.c.bf16 %v798_v54, %v798_v54 }
0x1359   :  { %809 = vrot.lane.b32.xlu2 %v799_v55, %s1032_s9 }
0x13b3   :  { %v810_v56 = vpop.permute.xlu2 %809 }
0x13b4   :  { %922 = vmatmul.msk.bf16.vlgmr.msra.gmra.mxu3 %vm128_vm0, %v810_v56 }
0x1437   :  { %v835_v58 = vpop.f32.mrf.mxu3 }
0x1438   :  { %v836_v59 = vadd.f32 %v941_v57, %v835_v58 }
0x143a   :  { %840 = vst.msk [vmem:[#allocation3] sm:$0x3] %vm839_vm5, %v836_v59 }
0x143b   :  { %851 = dma.vmem_to_hbm [thread:$0]  %s847_s26, 32, %s849_s29, [#allocation4]  }
0x143f   :  { %v837_v60 = vpop.f32.mrf.mxu3 }
0x1440   :  { %1030 = dma.done.wait [#allocation4], 32  }
0x1441   :  { %1031 = vsyncadd [#allocation4], 4294967264 }
0x1442   :  { %856 = vsyncpa [#allocation4], 1 }

</bundles_post_ra>
